<compile_context>
chip_gen: v7x
topology: tpu7x:2x2x1
jax: 0.10.0
libtpu: 0.0.40
codegen_flags: <defaults>
</compile_context>

<pallas_src>
import functools
import math

import jax
import jax.numpy as jnp
import numpy as np
from jax import lax
from jax.experimental import pallas as pl
from jax.experimental.pallas import tpu as pltpu


# --------------------------------- helpers ---------------------------------
def _rmsnorm(x, w, eps):
    xf = x.astype(jnp.float32)
    ms = jnp.mean(xf * xf, axis=-1, keepdims=True)
    return (xf * lax.rsqrt(ms + eps)) * w          # w: (1, H), broadcasts over rows


def _rotate_half(x, rn):
    # x: (rows, rn).  Returns concat(-x2, x1) along the last axis.
    half = rn // 2
    if rn % 128 == 0:
        # Rope region spans full lanes: one XLU roll + sign multiply (no slice/concat).
        sign = jnp.where(
            lax.broadcasted_iota(jnp.int32, (1, rn), 1) < half,
            jnp.float32(-1.0), jnp.float32(1.0)).astype(x.dtype)
        return pltpu.roll(x, shift=half, axis=-1) * sign
    x1 = x[:, :half]
    x2 = x[:, half:]
    return jnp.concatenate([-x2, x1], axis=-1)


def _apply_rope(xh, cos, sin, rn):
    # xh: (rows, hd);  cos/sin: (rows, rn)
    hd = xh.shape[-1]
    xr = xh[:, :rn]
    roped = xr * cos + _rotate_half(xr, rn) * sin
    if rn < hd:
        return jnp.concatenate([roped, xh[:, rn:]], axis=-1)
    return roped


# --------------------------------- kernel ----------------------------------
def block_kernel(x_ref, cos_ref, sin_ref, n1_ref, wqkv_ref, wo_ref,
                 n2_ref, w12_ref, w3_ref, out_ref, k_scr, v_scr,
                 *, hidden_dim, inter_dim, num_heads, head_dim, rope_n_elem,
                 sliding_window, eps, tile):
    f32 = jnp.float32
    H, I = hidden_dim, inter_dim
    nh, hd, rn = num_heads, head_dim, rope_n_elem
    T = tile
    cdtype = x_ref.dtype                       # matmul operand dtype (bf16 for bf16 models)
    qi = pl.program_id(1)
    q_start = pl.multiple_of(qi * T, T)
    scale = 1.0 / math.sqrt(hd)
    neg = jnp.float32(-1e30)

    # ---- RMSNorm + fused QKV projection for this tile: one (T,H)@(H,3H) matmul ----
    x_q = x_ref[0]                                                           # (T, H)
    xn = _rmsnorm(x_q, n1_ref[...], eps).astype(cdtype)
    qkv = jnp.dot(xn, wqkv_ref[...], preferred_element_type=f32)             # (T, 3H)
    cos_t = cos_ref[...].astype(f32)                                         # (T, rn)
    sin_t = sin_ref[...].astype(f32)

    # ---- incremental causal-frontier K/V build: the new KV tile == this q tile ----
    k_new = jnp.stack(
        [_apply_rope(qkv[:, H + h * hd:H + (h + 1) * hd], cos_t, sin_t, rn).astype(cdtype)
         for h in range(nh)], axis=0)                                        # (nh, T, hd)
    v_new = jnp.stack(
        [qkv[:, 2 * H + h * hd:2 * H + (h + 1) * hd].astype(cdtype)
         for h in range(nh)], axis=0)
    k_scr[:, pl.ds(q_start, T), :] = k_new
    v_scr[:, pl.ds(q_start, T), :] = v_new

    # ---- roped, scaled Q heads ----
    q_heads = jnp.stack(
        [(_apply_rope(qkv[:, h * hd:(h + 1) * hd], cos_t, sin_t, rn) * scale).astype(cdtype)
         for h in range(nh)], axis=0)                                        # (nh, T, hd)

    # ---- hoisted loop invariants (JAX does not CSE iota/broadcast) ----
    row = q_start + lax.broadcasted_iota(jnp.int32, (T, T), 0)
    col_base = lax.broadcasted_iota(jnp.int32, (T, T), 1)

    def tile_step(k_start, m, l, acc, valid):
        k_t = k_scr[:, pl.ds(k_start, T), :]                                 # (nh, T, hd)
        v_t = v_scr[:, pl.ds(k_start, T), :]
        s = jnp.einsum('nqd,nkd->nqk', q_heads, k_t,
                       preferred_element_type=f32)                           # (nh, T, T)
        if valid is not None:
            s = jnp.where(valid, s, neg)
        m_new = jnp.maximum(m, jnp.max(s, axis=-1, keepdims=True))
        p = jnp.exp(s - m_new)
        if valid is not None:
            p = jnp.where(valid, p, 0.0)       # needed when a whole row is masked
        alpha = jnp.exp(m - m_new)
        l_new = alpha * l + jnp.sum(p, axis=-1, keepdims=True)
        acc_new = alpha * acc + jnp.einsum('nqk,nkd->nqd', p.astype(cdtype), v_t,
                                           preferred_element_type=f32)
        return m_new, l_new, acc_new

    def body_full(kj, carry):                  # interior tile: no masking at all
        m, l, acc = carry
        return tile_step(pl.multiple_of(kj * T, T), m, l, acc, None)

    def body_window(kj, carry):                # sliding-window edge tile (kj < qi => no causal)
        m, l, acc = carry
        k_start = pl.multiple_of(kj * T, T)
        valid = ((row - (col_base + k_start)) <= sliding_window)[None]
        return tile_step(k_start, m, l, acc, valid)

    m0 = jnp.full((nh, T, 1), neg, dtype=f32)
    l0 = jnp.zeros((nh, T, 1), dtype=f32)
    a0 = jnp.zeros((nh, T, hd), dtype=f32)
    carry = (m0, l0, a0)

    if sliding_window >= 0:
        # first tile possibly inside the window for the first query row of this tile
        kv_lo = jnp.maximum(jnp.int32(0), (q_start - sliding_window) // T)
        # first tile needing NO window masking for any row of this q tile (ceil div)
        lo_full = jnp.clip((q_start + T - 1 - sliding_window + T - 1) // T, kv_lo, qi)
        carry = lax.fori_loop(kv_lo, lo_full, body_window, carry)   # window-masked edge
        carry = lax.fori_loop(lo_full, qi, body_full, carry)        # unmasked interior
    else:
        carry = lax.fori_loop(0, qi, body_full, carry)              # unmasked interior

    # ---- diagonal tile: causal mask (+ window mask only if it can trigger inside a tile) ----
    m, l, acc = carry
    col_d = col_base + q_start
    valid_d = col_d <= row
    if sliding_window >= 0 and (T - 1) > sliding_window:
        valid_d = jnp.logical_and(valid_d, (row - col_d) <= sliding_window)
    m, l, acc = tile_step(q_start, m, l, acc, valid_d[None])

    attn = acc * pl.reciprocal(l, approx=True)          # EUP reciprocal; (nh, T, hd) f32

    # ---- o_proj: single lane-dense (T,H)@(H,H) matmul ----
    o_in = jnp.concatenate([attn[h] for h in range(nh)], axis=-1).astype(cdtype)  # (T, H)
    o = jnp.dot(o_in, wo_ref[...], preferred_element_type=f32)
    x1 = x_q.astype(f32) + o                                                 # first residual

    # ---- SwiGLU MLP with fused fc1||fc2 up-projection ----
    xn2 = _rmsnorm(x1, n2_ref[...], eps).astype(cdtype)
    h12 = jnp.dot(xn2, w12_ref[...], preferred_element_type=f32)             # (T, 2I)
    h1 = h12[:, :I]
    h2 = h12[:, I:]
    g = ((h1 * jax.nn.sigmoid(h1)) * h2).astype(cdtype)
    mlp = jnp.dot(g, w3_ref[...], preferred_element_type=f32)
    out_ref[0] = (x1 + mlp).astype(out_ref.dtype)                            # second residual


# --------------------------------- wrapper ----------------------------------
def _default_tile(S):
    t = 256
    try:  # v5e: 4x128^2 MXU, single vst slot -> 128 tiles map better
        cv = str(getattr(pltpu.get_tpu_info(), "chip_version", "")).lower()
        if "v5" in cv or "5e" in cv or "5p" in cv:
            t = 128
    except Exception:
        pass
    return min(S, t)


def block_forward(x, cos, sin, params, *, head_dim, rope_n_elem,
                  sliding_window=-1, eps=1e-5, tile=None):
    B, S, H = x.shape
    nh = H // head_dim
    I = params["w1"].shape[1]
    rn = rope_n_elem

    if tile is None:
        tile = _default_tile(S)
    assert S % tile == 0, "seq len must divide the tile size"
    nq = S // tile

    # Pre-fuse fc1 || fc2 so the SwiGLU up-projection is one matmul.
    w12 = jnp.concatenate([params["w1"], params["w2"]], axis=-1)             # (H, 2I)
    n1 = params["norm1_w"].reshape(1, H)
    n2 = params["norm2_w"].reshape(1, H)

    kernel = functools.partial(
        block_kernel, hidden_dim=H, inter_dim=I, num_heads=nh, head_dim=head_dim,
        rope_n_elem=rn, sliding_window=sliding_window, eps=eps, tile=tile)

    # Constant-index operands (weights / norms): single resident copy in VMEM.
    vmem_full = pl.BlockSpec(memory_space=pltpu.MemorySpace.VMEM)

    # ---- generation-aware VMEM budget (accounts for lane padding of K/V scratch) ----
    itemsize = jnp.dtype(x.dtype).itemsize
    lane = lambda n: ((n + 127) // 128) * 128
    sub = lambda n: ((n + 7) // 8) * 8
    w_bytes = (H * lane(3 * H) + H * lane(H) + H * lane(2 * I) + I * lane(H)
               + 2 * lane(H)) * itemsize
    kv_bytes = 2 * nh * sub(S) * lane(head_dim) * itemsize      # single copy each (scratch)
    stream_bytes = 2 * (2 * sub(tile) * lane(H) + 2 * sub(tile) * lane(rn)) * itemsize
    act_bytes = 8 * sub(tile) * lane(max(3 * H, 2 * I)) * 4     # f32 activation headroom
    est = w_bytes + kv_bytes + stream_bytes + act_bytes

    phys = 64 * 2**20
    try:
        phys = int(getattr(pltpu.get_tpu_info(), "vmem_capacity_bytes", phys) or phys)
    except Exception:
        pass
    vmem_limit = int(min(max(phys - 8 * 2**20, 16 * 2**20),     # never exceed physical VMEM
                         max(32 * 2**20, int(est * 1.25))))

    grid_spec = pltpu.PrefetchScalarGridSpec(
        num_scalar_prefetch=0,
        grid=(B, nq),
        in_specs=[
            pl.BlockSpec((1, tile, H), lambda b, q: (b, q, 0)),   # x: per-tile stream
            pl.BlockSpec((tile, rn), lambda b, q: (q, 0)),        # cos
            pl.BlockSpec((tile, rn), lambda b, q: (q, 0)),        # sin
            vmem_full,   # attn norm weight
            vmem_full,   # qkv_proj
            vmem_full,   # o_proj
            vmem_full,   # mlp norm weight
            vmem_full,   # fc1 || fc2
            vmem_full,   # fc3
        ],
        out_specs=pl.BlockSpec((1, tile, H), lambda b, q: (b, q, 0)),
        scratch_shapes=[
            pltpu.VMEM((nh, S, head_dim), x.dtype),   # roped K, built incrementally per q tile
            pltpu.VMEM((nh, S, head_dim), x.dtype),   # V
        ],
    )

    return pl.pallas_call(
        kernel,
        out_shape=jax.ShapeDtypeStruct((B, S, H), x.dtype),
        grid_spec=grid_spec,
        compiler_params=pltpu.CompilerParams(
            dimension_semantics=("parallel", "arbitrary"),
            vmem_limit_bytes=vmem_limit),
    )(x, cos, sin, n1, params["wqkv"], params["wo"], n2, w12, params["w3"])


# ------------------------- pure-JAX reference (validation) -------------------------
def block_reference(x, cos, sin, params, *, head_dim, rope_n_elem,
                    sliding_window=-1, eps=1e-5):
    B, S, H = x.shape
    nh = H // head_dim

    def rmsnorm(v, w):
        vf = v.astype(jnp.float32)
        ms = jnp.mean(vf * vf, axis=-1, keepdims=True)
        return vf * lax.rsqrt(ms + eps) * w

    def rope(t):  # t: (B, nh, S, rn)
        half = rope_n_elem // 2
        t1, t2 = t[..., :half], t[..., half:]
        rot = jnp.concatenate([-t2, t1], axis=-1)
        return t * cos + rot * sin

    xn = rmsnorm(x, params["norm1_w"])
    qkv = xn @ params["wqkv"]
    q, k, v = jnp.split(qkv, 3, axis=-1)
    to_heads = lambda t: t.reshape(B, S, nh, head_dim).transpose(0, 2, 1, 3)
    q, k, v = map(to_heads, (q, k, v))
    q = jnp.concatenate([rope(q[..., :rope_n_elem]), q[..., rope_n_elem:]], axis=-1)
    k = jnp.concatenate([rope(k[..., :rope_n_elem]), k[..., rope_n_elem:]], axis=-1)
    s = jnp.einsum("bhqd,bhkd->bhqk", q, k) / math.sqrt(head_dim)
    row = jnp.arange(S)[:, None]
    col = jnp.arange(S)[None, :]
    mask = col <= row
    if sliding_window >= 0:
        mask = mask & ((row - col) <= sliding_window)
    s = jnp.where(mask, s, -1e30)
    p = jax.nn.softmax(s, axis=-1)
    o = jnp.einsum("bhqk,bhkd->bhqd", p, v).transpose(0, 2, 1, 3).reshape(B, S, H)
    x1 = x + o @ params["wo"]
    xn2 = rmsnorm(x1, params["norm2_w"])
    g = jax.nn.silu(xn2 @ params["w1"]) * (xn2 @ params["w2"])
    return x1 + g @ params["w3"]


def _make_rope_cache(S, rn):
    half = rn // 2
    inv_freq = 1.0 / (10000.0 ** (jnp.arange(half, dtype=jnp.float32) / half))
    angles = jnp.outer(jnp.arange(S, dtype=jnp.float32), inv_freq)   # (S, rn/2)
    angles = jnp.concatenate([angles, angles], axis=-1)              # (S, rn)
    return jnp.cos(angles), jnp.sin(angles)


def _run_case(B, S, H, I, head_dim, rn, sliding_window, tile=None):
    key = jax.random.PRNGKey(0)
    ks = jax.random.split(key, 8)
    f32 = jnp.float32
    params = {
        "norm1_w": 1.0 + 0.1 * jax.random.normal(ks[0], (H,), f32),
        "wqkv":    0.08 * jax.random.normal(ks[1], (H, 3 * H), f32),
        "wo":      0.08 * jax.random.normal(ks[2], (H, H), f32),
        "norm2_w": 1.0 + 0.1 * jax.random.normal(ks[3], (H,), f32),
        "w1":      0.08 * jax.random.normal(ks[4], (H, I), f32),
        "w2":      0.08 * jax.random.normal(ks[5], (H, I), f32),
        "w3":      0.08 * jax.random.normal(ks[6], (I, H), f32),
    }
    x = jax.random.normal(ks[7], (B, S, H), f32)
    cos, sin = _make_rope_cache(S, rn)

    out = block_forward(x, cos, sin, params, head_dim=head_dim, rope_n_elem=rn,
                        sliding_window=sliding_window, tile=tile)
    out = jax.block_until_ready(out)

    ref = block_reference(x, cos, sin, params, head_dim=head_dim, rope_n_elem=rn,
                          sliding_window=sliding_window)
    # Tolerance loosened vs. 2e-5 because the final 1/l uses the EUP approx reciprocal.
    np.testing.assert_allclose(np.asarray(out), np.asarray(ref), rtol=2e-3, atol=2e-3)


if __name__ == "__main__":
    # Case 1: plain causal attention, single tile (toy shapes from the module).
    _run_case(B=2, S=8, H=32, I=64, head_dim=16, rn=8, sliding_window=-1)
    # Case 2: several tiles + sliding window — exercises the window-masked edge loop,
    # the unmasked interior loop, the masked diagonal tile and incremental KV build.
    _run_case(B=2, S=32, H=32, I=64, head_dim=16, rn=8, sliding_window=5, tile=8)
    # Case 3: pure causal with multiple tiles — exercises the unmasked interior loop.
    _run_case(B=1, S=64, H=64, I=128, head_dim=32, rn=16, sliding_window=-1, tile=16)
    print("KERNEL_OK")
</pallas_src>

<mosaic_0001>
module attributes {stable_mosaic.version = 11 : i64} {
  func.func @block_kernel(%arg0: i32, %arg1: i32, %arg2: memref<1x8x32xf32, #tpu.memory_space<vmem>>, %arg3: memref<8x8xf32, #tpu.memory_space<vmem>>, %arg4: memref<8x8xf32, #tpu.memory_space<vmem>>, %arg5: memref<1x32xf32, #tpu.memory_space<vmem>>, %arg6: memref<32x96xf32, #tpu.memory_space<vmem>>, %arg7: memref<32x32xf32, #tpu.memory_space<vmem>>, %arg8: memref<1x32xf32, #tpu.memory_space<vmem>>, %arg9: memref<32x128xf32, #tpu.memory_space<vmem>>, %arg10: memref<64x32xf32, #tpu.memory_space<vmem>>, %arg11: memref<1x8x32xf32, #tpu.memory_space<vmem>>, %arg12: memref<2x8x16xf32, #tpu.memory_space<vmem>>, %arg13: memref<2x8x16xf32, #tpu.memory_space<vmem>>) attributes {dimension_semantics = [#tpu.dimension_semantics<parallel>, #tpu.dimension_semantics<arbitrary>], iteration_bounds = array<i64: 2, 1>, scalar_prefetch = 0 : i64, scratch_operands = 2 : i64, tpu.core_type = #tpu.core_type<tc>, window_params = [{transform_indices = @transform_0, window_bounds = array<i64: 1, 8, 32>}, {transform_indices = @transform_1, window_bounds = array<i64: 8, 8>}, {transform_indices = @transform_2, window_bounds = array<i64: 8, 8>}, {pipeline_mode = #tpu.pipeline_mode<synchronous>, transform_indices = @transform_3, window_bounds = array<i64: 1, 32>}, {pipeline_mode = #tpu.pipeline_mode<synchronous>, transform_indices = @transform_4, window_bounds = array<i64: 32, 96>}, {pipeline_mode = #tpu.pipeline_mode<synchronous>, transform_indices = @transform_5, window_bounds = array<i64: 32, 32>}, {pipeline_mode = #tpu.pipeline_mode<synchronous>, transform_indices = @transform_6, window_bounds = array<i64: 1, 32>}, {pipeline_mode = #tpu.pipeline_mode<synchronous>, transform_indices = @transform_7, window_bounds = array<i64: 32, 128>}, {pipeline_mode = #tpu.pipeline_mode<synchronous>, transform_indices = @transform_8, window_bounds = array<i64: 64, 32>}, {transform_indices = @transform_9, window_bounds = array<i64: 1, 8, 32>}]} {
    %c8_i32 = arith.constant 8 : i32
    %0 = arith.muli %arg1, %c8_i32 : i32
    %1 = tpu.assume_multiple %0, 8 : i32
    %c0 = arith.constant 0 : index
    %c0_0 = arith.constant 0 : index
    %c0_1 = arith.constant 0 : index
    %2 = vector.load %arg2[%c0, %c0_0, %c0_1] : memref<1x8x32xf32, #tpu.memory_space<vmem>>, vector<1x8x32xf32>
    %3 = vector.shape_cast %2 : vector<1x8x32xf32> to vector<8x32xf32>
    %c0_2 = arith.constant 0 : index
    %c0_3 = arith.constant 0 : index
    %4 = vector.load %arg5[%c0_2, %c0_3] : memref<1x32xf32, #tpu.memory_space<vmem>>, vector<1x32xf32>
    %5 = arith.mulf %3, %3 : vector<8x32xf32>
    %cst = arith.constant dense<0.000000e+00> : vector<8xf32>
    %6 = vector.multi_reduction <add>, %5, %cst [1] : vector<8x32xf32> to vector<8xf32>
    %7 = vector.shape_cast %6 : vector<8xf32> to vector<8x1xf32>
    %cst_4 = arith.constant 3.200000e+01 : f32
    %8 = vector.broadcast %cst_4 : f32 to vector<8x1xf32>
    %9 = arith.divf %7, %8 : vector<8x1xf32>
    %cst_5 = arith.constant 9.99999974E-6 : f32
    %10 = vector.broadcast %cst_5 : f32 to vector<8x1xf32>
    %11 = arith.addf %9, %10 : vector<8x1xf32>
    %12 = math.rsqrt %11 : vector<8x1xf32>
    %13 = vector.broadcast %12 : vector<8x1xf32> to vector<8x32xf32>
    %14 = arith.mulf %3, %13 : vector<8x32xf32>
    %15 = vector.broadcast %4 : vector<1x32xf32> to vector<8x32xf32>
    %16 = arith.mulf %14, %15 : vector<8x32xf32>
    %c0_6 = arith.constant 0 : index
    %c0_7 = arith.constant 0 : index
    %17 = vector.load %arg6[%c0_6, %c0_7] : memref<32x96xf32, #tpu.memory_space<vmem>>, vector<32x96xf32>
    %cst_8 = arith.constant dense<0.000000e+00> : vector<8x96xf32>
    %18 = tpu.matmul %16, %17, %cst_8 {dimension_numbers = #tpu.dot_dimension_numbers<[1], [0], [0], [1], [0, 0, 1, 1], [], []>} : vector<8x32xf32>, vector<32x96xf32>, vector<8x96xf32> -> vector<8x96xf32>
    %c0_9 = arith.constant 0 : index
    %c0_10 = arith.constant 0 : index
    %19 = vector.load %arg3[%c0_9, %c0_10] : memref<8x8xf32, #tpu.memory_space<vmem>>, vector<8x8xf32>
    %c0_11 = arith.constant 0 : index
    %c0_12 = arith.constant 0 : index
    %20 = vector.load %arg4[%c0_11, %c0_12] : memref<8x8xf32, #tpu.memory_space<vmem>>, vector<8x8xf32>
    %21 = vector.extract_strided_slice %18 {offsets = [0, 32], sizes = [8, 16], strides = [1, 1]} : vector<8x96xf32> to vector<8x16xf32>
    %22 = vector.extract_strided_slice %21 {offsets = [0, 0], sizes = [8, 8], strides = [1, 1]} : vector<8x16xf32> to vector<8x8xf32>
    %23 = arith.mulf %22, %19 : vector<8x8xf32>
    %24 = vector.extract_strided_slice %22 {offsets = [0, 0], sizes = [8, 4], strides = [1, 1]} : vector<8x8xf32> to vector<8x4xf32>
    %25 = vector.extract_strided_slice %22 {offsets = [0, 4], sizes = [8, 4], strides = [1, 1]} : vector<8x8xf32> to vector<8x4xf32>
    %cst_13 = arith.constant 0.000000e+00 : f32
    %26 = vector.broadcast %cst_13 : f32 to vector<8x4xf32>
    %27 = arith.subf %26, %25 : vector<8x4xf32>
    %28 = tpu.concatenate %27, %24 in 1 : vector<8x4xf32>, vector<8x4xf32> -> vector<8x8xf32>
    %29 = arith.mulf %28, %20 : vector<8x8xf32>
    %30 = arith.addf %23, %29 : vector<8x8xf32>
    %31 = vector.extract_strided_slice %21 {offsets = [0, 8], sizes = [8, 8], strides = [1, 1]} : vector<8x16xf32> to vector<8x8xf32>
    %32 = tpu.concatenate %30, %31 in 1 : vector<8x8xf32>, vector<8x8xf32> -> vector<8x16xf32>
    %33 = vector.extract_strided_slice %18 {offsets = [0, 48], sizes = [8, 16], strides = [1, 1]} : vector<8x96xf32> to vector<8x16xf32>
    %34 = vector.extract_strided_slice %33 {offsets = [0, 0], sizes = [8, 8], strides = [1, 1]} : vector<8x16xf32> to vector<8x8xf32>
    %35 = arith.mulf %34, %19 : vector<8x8xf32>
    %36 = vector.extract_strided_slice %34 {offsets = [0, 0], sizes = [8, 4], strides = [1, 1]} : vector<8x8xf32> to vector<8x4xf32>
    %37 = vector.extract_strided_slice %34 {offsets = [0, 4], sizes = [8, 4], strides = [1, 1]} : vector<8x8xf32> to vector<8x4xf32>
    %cst_14 = arith.constant 0.000000e+00 : f32
    %38 = vector.broadcast %cst_14 : f32 to vector<8x4xf32>
    %39 = arith.subf %38, %37 : vector<8x4xf32>
    %40 = tpu.concatenate %39, %36 in 1 : vector<8x4xf32>, vector<8x4xf32> -> vector<8x8xf32>
    %41 = arith.mulf %40, %20 : vector<8x8xf32>
    %42 = arith.addf %35, %41 : vector<8x8xf32>
    %43 = vector.extract_strided_slice %33 {offsets = [0, 8], sizes = [8, 8], strides = [1, 1]} : vector<8x16xf32> to vector<8x8xf32>
    %44 = tpu.concatenate %42, %43 in 1 : vector<8x8xf32>, vector<8x8xf32> -> vector<8x16xf32>
    %45 = vector.shape_cast %32 : vector<8x16xf32> to vector<1x8x16xf32>
    %46 = vector.shape_cast %44 : vector<8x16xf32> to vector<1x8x16xf32>
    %47 = tpu.concatenate %45, %46 in 0 : vector<1x8x16xf32>, vector<1x8x16xf32> -> vector<2x8x16xf32>
    %48 = vector.extract_strided_slice %18 {offsets = [0, 64], sizes = [8, 16], strides = [1, 1]} : vector<8x96xf32> to vector<8x16xf32>
    %49 = vector.extract_strided_slice %18 {offsets = [0, 80], sizes = [8, 16], strides = [1, 1]} : vector<8x96xf32> to vector<8x16xf32>
    %50 = vector.shape_cast %48 : vector<8x16xf32> to vector<1x8x16xf32>
    %51 = vector.shape_cast %49 : vector<8x16xf32> to vector<1x8x16xf32>
    %52 = tpu.concatenate %50, %51 in 0 : vector<1x8x16xf32>, vector<1x8x16xf32> -> vector<2x8x16xf32>
    %c0_15 = arith.constant 0 : index
    %53 = arith.index_cast %1 : i32 to index
    %c0_16 = arith.constant 0 : index
    %54 = vector.load %arg12[%c0_15, %53, %c0_16] : memref<2x8x16xf32, #tpu.memory_space<vmem>>, vector<2x8x16xf32>
    tpu.vector_store %arg12[%c0_15, %53, %c0_16], %47 {strides = array<i32>} : memref<2x8x16xf32, #tpu.memory_space<vmem>>, vector<2x8x16xf32>,
    %c0_17 = arith.constant 0 : index
    %55 = arith.index_cast %1 : i32 to index
    %c0_18 = arith.constant 0 : index
    %56 = vector.load %arg13[%c0_17, %55, %c0_18] : memref<2x8x16xf32, #tpu.memory_space<vmem>>, vector<2x8x16xf32>
    tpu.vector_store %arg13[%c0_17, %55, %c0_18], %52 {strides = array<i32>} : memref<2x8x16xf32, #tpu.memory_space<vmem>>, vector<2x8x16xf32>,
    %57 = vector.extract_strided_slice %18 {offsets = [0, 0], sizes = [8, 16], strides = [1, 1]} : vector<8x96xf32> to vector<8x16xf32>
    %58 = vector.extract_strided_slice %57 {offsets = [0, 0], sizes = [8, 8], strides = [1, 1]} : vector<8x16xf32> to vector<8x8xf32>
    %59 = arith.mulf %58, %19 : vector<8x8xf32>
    %60 = vector.extract_strided_slice %58 {offsets = [0, 0], sizes = [8, 4], strides = [1, 1]} : vector<8x8xf32> to vector<8x4xf32>
    %61 = vector.extract_strided_slice %58 {offsets = [0, 4], sizes = [8, 4], strides = [1, 1]} : vector<8x8xf32> to vector<8x4xf32>
    %cst_19 = arith.constant 0.000000e+00 : f32
    %62 = vector.broadcast %cst_19 : f32 to vector<8x4xf32>
    %63 = arith.subf %62, %61 : vector<8x4xf32>
    %64 = tpu.concatenate %63, %60 in 1 : vector<8x4xf32>, vector<8x4xf32> -> vector<8x8xf32>
    %65 = arith.mulf %64, %20 : vector<8x8xf32>
    %66 = arith.addf %59, %65 : vector<8x8xf32>
    %67 = vector.extract_strided_slice %57 {offsets = [0, 8], sizes = [8, 8], strides = [1, 1]} : vector<8x16xf32> to vector<8x8xf32>
    %68 = tpu.concatenate %66, %67 in 1 : vector<8x8xf32>, vector<8x8xf32> -> vector<8x16xf32>
    %cst_20 = arith.constant 2.500000e-01 : f32
    %69 = vector.broadcast %cst_20 : f32 to vector<8x16xf32>
    %70 = arith.mulf %68, %69 : vector<8x16xf32>
    %71 = vector.extract_strided_slice %18 {offsets = [0, 16], sizes = [8, 16], strides = [1, 1]} : vector<8x96xf32> to vector<8x16xf32>
    %72 = vector.extract_strided_slice %71 {offsets = [0, 0], sizes = [8, 8], strides = [1, 1]} : vector<8x16xf32> to vector<8x8xf32>
    %73 = arith.mulf %72, %19 : vector<8x8xf32>
    %74 = vector.extract_strided_slice %72 {offsets = [0, 0], sizes = [8, 4], strides = [1, 1]} : vector<8x8xf32> to vector<8x4xf32>
    %75 = vector.extract_strided_slice %72 {offsets = [0, 4], sizes = [8, 4], strides = [1, 1]} : vector<8x8xf32> to vector<8x4xf32>
    %cst_21 = arith.constant 0.000000e+00 : f32
    %76 = vector.broadcast %cst_21 : f32 to vector<8x4xf32>
    %77 = arith.subf %76, %75 : vector<8x4xf32>
    %78 = tpu.concatenate %77, %74 in 1 : vector<8x4xf32>, vector<8x4xf32> -> vector<8x8xf32>
    %79 = arith.mulf %78, %20 : vector<8x8xf32>
    %80 = arith.addf %73, %79 : vector<8x8xf32>
    %81 = vector.extract_strided_slice %71 {offsets = [0, 8], sizes = [8, 8], strides = [1, 1]} : vector<8x16xf32> to vector<8x8xf32>
    %82 = tpu.concatenate %80, %81 in 1 : vector<8x8xf32>, vector<8x8xf32> -> vector<8x16xf32>
    %cst_22 = arith.constant 2.500000e-01 : f32
    %83 = vector.broadcast %cst_22 : f32 to vector<8x16xf32>
    %84 = arith.mulf %82, %83 : vector<8x16xf32>
    %85 = vector.shape_cast %70 : vector<8x16xf32> to vector<1x8x16xf32>
    %86 = vector.shape_cast %84 : vector<8x16xf32> to vector<1x8x16xf32>
    %87 = tpu.concatenate %85, %86 in 0 : vector<1x8x16xf32>, vector<1x8x16xf32> -> vector<2x8x16xf32>
    %88 = tpu.iota {dimensions = array<i32: 0>} : vector<8x8xi32>
    %89 = vector.broadcast %1 : i32 to vector<8x8xi32>
    %90 = arith.addi %89, %88 : vector<8x8xi32>
    %91 = tpu.iota {dimensions = array<i32: 1>} : vector<8x8xi32>
    %cst_23 = arith.constant -1.000000e+30 : f32
    %92 = vector.broadcast %cst_23 : f32 to vector<2x8x1xf32>
    %cst_24 = arith.constant 0.000000e+00 : f32
    %93 = vector.broadcast %cst_24 : f32 to vector<2x8x1xf32>
    %cst_25 = arith.constant 0.000000e+00 : f32
    %94 = vector.broadcast %cst_25 : f32 to vector<2x8x16xf32>
    %c0_i32 = arith.constant 0 : i32
    %95 = arith.subi %arg1, %c0_i32 : i32
    %96 = arith.addi %c0_i32, %95 : i32
    %c1_i32 = arith.constant 1 : i32
    %97:3 = scf.for %arg14 = %c0_i32 to %96 step %c1_i32 iter_args(%arg15 = %92, %arg16 = %93, %arg17 = %94) -> (vector<2x8x1xf32>, vector<2x8x1xf32>, vector<2x8x16xf32>)  : i32 {
      %c8_i32_54 = arith.constant 8 : i32
      %172 = arith.muli %arg14, %c8_i32_54 : i32
      %173 = tpu.assume_multiple %172, 8 : i32
      %c0_55 = arith.constant 0 : index
      %174 = arith.index_cast %173 : i32 to index
      %c0_56 = arith.constant 0 : index
      %175 = vector.load %arg12[%c0_55, %174, %c0_56] : memref<2x8x16xf32, #tpu.memory_space<vmem>>, vector<2x8x16xf32>
      %c0_57 = arith.constant 0 : index
      %176 = arith.index_cast %173 : i32 to index
      %c0_58 = arith.constant 0 : index
      %177 = vector.load %arg13[%c0_57, %176, %c0_58] : memref<2x8x16xf32, #tpu.memory_space<vmem>>, vector<2x8x16xf32>
      "tpu.trace_start"() <{level = 10 : i32, message = "nqd,nkd->nqk"}> : () -> ()
      %cst_59 = arith.constant dense<0.000000e+00> : vector<2x8x8xf32>
      %178 = tpu.matmul %87, %175, %cst_59 {dimension_numbers = #tpu.dot_dimension_numbers<[2], [2], [1], [1], [0, 0, 0, 1, 1, 1], [0], [0]>} : vector<2x8x16xf32>, vector<2x8x16xf32>, vector<2x8x8xf32> -> vector<2x8x8xf32>
      "tpu.trace_stop"() : () -> ()
      %cst_60 = arith.constant dense<0xFF800000> : vector<2x8xf32>
      %179 = vector.multi_reduction <maximumf>, %178, %cst_60 [2] : vector<2x8x8xf32> to vector<2x8xf32>
      %180 = vector.shape_cast %179 : vector<2x8xf32> to vector<2x8x1xf32>
      %181 = arith.maximumf %arg15, %180 : vector<2x8x1xf32>
      %182 = vector.broadcast %181 : vector<2x8x1xf32> to vector<2x8x8xf32>
      %183 = arith.subf %178, %182 : vector<2x8x8xf32>
      %184 = math.exp %183 : vector<2x8x8xf32>
      %185 = arith.subf %arg15, %181 : vector<2x8x1xf32>
      %186 = math.exp %185 : vector<2x8x1xf32>
      %187 = arith.mulf %186, %arg16 : vector<2x8x1xf32>
      %cst_61 = arith.constant dense<0.000000e+00> : vector<2x8xf32>
      %188 = vector.multi_reduction <add>, %184, %cst_61 [2] : vector<2x8x8xf32> to vector<2x8xf32>
      %189 = vector.shape_cast %188 : vector<2x8xf32> to vector<2x8x1xf32>
      %190 = arith.addf %187, %189 : vector<2x8x1xf32>
      %191 = vector.broadcast %186 : vector<2x8x1xf32> to vector<2x8x16xf32>
      %192 = arith.mulf %191, %arg17 : vector<2x8x16xf32>
      "tpu.trace_start"() <{level = 10 : i32, message = "nqk,nkd->nqd"}> : () -> ()
      %cst_62 = arith.constant dense<0.000000e+00> : vector<2x8x16xf32>
      %193 = tpu.matmul %184, %177, %cst_62 {dimension_numbers = #tpu.dot_dimension_numbers<[2], [1], [1], [2], [0, 0, 0, 1, 1, 2], [0], [0]>} : vector<2x8x8xf32>, vector<2x8x16xf32>, vector<2x8x16xf32> -> vector<2x8x16xf32>
      "tpu.trace_stop"() : () -> ()
      %194 = arith.addf %192, %193 : vector<2x8x16xf32>
      scf.yield %181, %190, %194 : vector<2x8x1xf32>, vector<2x8x1xf32>, vector<2x8x16xf32>
    }
    %98 = vector.broadcast %1 : i32 to vector<8x8xi32>
    %99 = arith.addi %91, %98 : vector<8x8xi32>
    %100 = arith.cmpi sle, %99, %90 : vector<8x8xi32>
    %101 = vector.shape_cast %100 : vector<8x8xi1> to vector<1x8x8xi1>
    %c0_26 = arith.constant 0 : index
    %102 = arith.index_cast %1 : i32 to index
    %c0_27 = arith.constant 0 : index
    %103 = vector.load %arg12[%c0_26, %102, %c0_27] : memref<2x8x16xf32, #tpu.memory_space<vmem>>, vector<2x8x16xf32>
    %c0_28 = arith.constant 0 : index
    %104 = arith.index_cast %1 : i32 to index
    %c0_29 = arith.constant 0 : index
    %105 = vector.load %arg13[%c0_28, %104, %c0_29] : memref<2x8x16xf32, #tpu.memory_space<vmem>>, vector<2x8x16xf32>
    "tpu.trace_start"() <{level = 10 : i32, message = "nqd,nkd->nqk"}> : () -> ()
    %cst_30 = arith.constant dense<0.000000e+00> : vector<2x8x8xf32>
    %106 = tpu.matmul %87, %103, %cst_30 {dimension_numbers = #tpu.dot_dimension_numbers<[2], [2], [1], [1], [0, 0, 0, 1, 1, 1], [0], [0]>} : vector<2x8x16xf32>, vector<2x8x16xf32>, vector<2x8x8xf32> -> vector<2x8x8xf32>
    %cst_31 = arith.constant -1.000000e+30 : f32
    "tpu.trace_stop"() : () -> ()
    %107 = vector.shape_cast %101 : vector<1x8x8xi1> to vector<1x8x8xi1>
    %108 = vector.broadcast %107 : vector<1x8x8xi1> to vector<2x8x8xi1>
    %109 = vector.broadcast %cst_31 : f32 to vector<2x8x8xf32>
    %110 = arith.select %108, %106, %109 : vector<2x8x8xi1>, vector<2x8x8xf32>
    %cst_32 = arith.constant dense<0xFF800000> : vector<2x8xf32>
    %111 = vector.multi_reduction <maximumf>, %110, %cst_32 [2] : vector<2x8x8xf32> to vector<2x8xf32>
    %112 = vector.shape_cast %111 : vector<2x8xf32> to vector<2x8x1xf32>
    %113 = arith.maximumf %97#0, %112 : vector<2x8x1xf32>
    %114 = vector.broadcast %113 : vector<2x8x1xf32> to vector<2x8x8xf32>
    %115 = arith.subf %110, %114 : vector<2x8x8xf32>
    %116 = math.exp %115 : vector<2x8x8xf32>
    %cst_33 = arith.constant 0.000000e+00 : f32
    %117 = vector.shape_cast %101 : vector<1x8x8xi1> to vector<1x8x8xi1>
    %118 = vector.broadcast %117 : vector<1x8x8xi1> to vector<2x8x8xi1>
    %119 = vector.broadcast %cst_33 : f32 to vector<2x8x8xf32>
    %120 = arith.select %118, %116, %119 : vector<2x8x8xi1>, vector<2x8x8xf32>
    %121 = arith.subf %97#0, %113 : vector<2x8x1xf32>
    %122 = math.exp %121 : vector<2x8x1xf32>
    %123 = arith.mulf %122, %97#1 : vector<2x8x1xf32>
    %cst_34 = arith.constant dense<0.000000e+00> : vector<2x8xf32>
    %124 = vector.multi_reduction <add>, %120, %cst_34 [2] : vector<2x8x8xf32> to vector<2x8xf32>
    %125 = vector.shape_cast %124 : vector<2x8xf32> to vector<2x8x1xf32>
    %126 = arith.addf %123, %125 : vector<2x8x1xf32>
    %127 = vector.broadcast %122 : vector<2x8x1xf32> to vector<2x8x16xf32>
    %128 = arith.mulf %127, %97#2 : vector<2x8x16xf32>
    "tpu.trace_start"() <{level = 10 : i32, message = "nqk,nkd->nqd"}> : () -> ()
    %cst_35 = arith.constant dense<0.000000e+00> : vector<2x8x16xf32>
    %129 = tpu.matmul %120, %105, %cst_35 {dimension_numbers = #tpu.dot_dimension_numbers<[2], [1], [1], [2], [0, 0, 0, 1, 1, 2], [0], [0]>} : vector<2x8x8xf32>, vector<2x8x16xf32>, vector<2x8x16xf32> -> vector<2x8x16xf32>
    "tpu.trace_stop"() : () -> ()
    %130 = arith.addf %128, %129 : vector<2x8x16xf32>
    %131 = tpu.reciprocal %126 {approx = true} : vector<2x8x1xf32> -> vector<2x8x1xf32>
    %132 = vector.broadcast %131 : vector<2x8x1xf32> to vector<2x8x16xf32>
    %133 = arith.mulf %130, %132 : vector<2x8x16xf32>
    %134 = vector.extract_strided_slice %133 {offsets = [0, 0, 0], sizes = [1, 8, 16], strides = [1, 1, 1]} : vector<2x8x16xf32> to vector<1x8x16xf32>
    %135 = vector.shape_cast %134 : vector<1x8x16xf32> to vector<8x16xf32>
    %136 = vector.extract_strided_slice %133 {offsets = [1, 0, 0], sizes = [1, 8, 16], strides = [1, 1, 1]} : vector<2x8x16xf32> to vector<1x8x16xf32>
    %137 = vector.shape_cast %136 : vector<1x8x16xf32> to vector<8x16xf32>
    %138 = tpu.concatenate %135, %137 in 1 : vector<8x16xf32>, vector<8x16xf32> -> vector<8x32xf32>
    %c0_36 = arith.constant 0 : index
    %c0_37 = arith.constant 0 : index
    %139 = vector.load %arg7[%c0_36, %c0_37] : memref<32x32xf32, #tpu.memory_space<vmem>>, vector<32x32xf32>
    %cst_38 = arith.constant dense<0.000000e+00> : vector<8x32xf32>
    %140 = tpu.matmul %138, %139, %cst_38 {dimension_numbers = #tpu.dot_dimension_numbers<[1], [0], [0], [1], [0, 0, 1, 1], [], []>} : vector<8x32xf32>, vector<32x32xf32>, vector<8x32xf32> -> vector<8x32xf32>
    %141 = arith.addf %3, %140 : vector<8x32xf32>
    %c0_39 = arith.constant 0 : index
    %c0_40 = arith.constant 0 : index
    %142 = vector.load %arg8[%c0_39, %c0_40] : memref<1x32xf32, #tpu.memory_space<vmem>>, vector<1x32xf32>
    %143 = arith.mulf %141, %141 : vector<8x32xf32>
    %cst_41 = arith.constant dense<0.000000e+00> : vector<8xf32>
    %144 = vector.multi_reduction <add>, %143, %cst_41 [1] : vector<8x32xf32> to vector<8xf32>
    %145 = vector.shape_cast %144 : vector<8xf32> to vector<8x1xf32>
    %cst_42 = arith.constant 3.200000e+01 : f32
    %146 = vector.broadcast %cst_42 : f32 to vector<8x1xf32>
    %147 = arith.divf %145, %146 : vector<8x1xf32>
    %cst_43 = arith.constant 9.99999974E-6 : f32
    %148 = vector.broadcast %cst_43 : f32 to vector<8x1xf32>
    %149 = arith.addf %147, %148 : vector<8x1xf32>
    %150 = math.rsqrt %149 : vector<8x1xf32>
    %151 = vector.broadcast %150 : vector<8x1xf32> to vector<8x32xf32>
    %152 = arith.mulf %141, %151 : vector<8x32xf32>
    %153 = vector.broadcast %142 : vector<1x32xf32> to vector<8x32xf32>
    %154 = arith.mulf %152, %153 : vector<8x32xf32>
    %c0_44 = arith.constant 0 : index
    %c0_45 = arith.constant 0 : index
    %155 = vector.load %arg9[%c0_44, %c0_45] : memref<32x128xf32, #tpu.memory_space<vmem>>, vector<32x128xf32>
    %cst_46 = arith.constant dense<0.000000e+00> : vector<8x128xf32>
    %156 = tpu.matmul %154, %155, %cst_46 {dimension_numbers = #tpu.dot_dimension_numbers<[1], [0], [0], [1], [0, 0, 1, 1], [], []>} : vector<8x32xf32>, vector<32x128xf32>, vector<8x128xf32> -> vector<8x128xf32>
    %157 = vector.extract_strided_slice %156 {offsets = [0, 0], sizes = [8, 64], strides = [1, 1]} : vector<8x128xf32> to vector<8x64xf32>
    %158 = vector.extract_strided_slice %156 {offsets = [0, 64], sizes = [8, 64], strides = [1, 1]} : vector<8x128xf32> to vector<8x64xf32>
    %159 = arith.negf %157 : vector<8x64xf32>
    %160 = math.exp %159 : vector<8x64xf32>
    %cst_47 = arith.constant 1.000000e+00 : f32
    %161 = vector.broadcast %cst_47 : f32 to vector<8x64xf32>
    %162 = arith.addf %161, %160 : vector<8x64xf32>
    %163 = arith.divf %161, %162 : vector<8x64xf32>
    %164 = arith.mulf %157, %163 : vector<8x64xf32>
    %165 = arith.mulf %164, %158 : vector<8x64xf32>
    %c0_48 = arith.constant 0 : index
    %c0_49 = arith.constant 0 : index
    %166 = vector.load %arg10[%c0_48, %c0_49] : memref<64x32xf32, #tpu.memory_space<vmem>>, vector<64x32xf32>
    %cst_50 = arith.constant dense<0.000000e+00> : vector<8x32xf32>
    %167 = tpu.matmul %165, %166, %cst_50 {dimension_numbers = #tpu.dot_dimension_numbers<[1], [0], [0], [1], [0, 0, 1, 1], [], []>} : vector<8x64xf32>, vector<64x32xf32>, vector<8x32xf32> -> vector<8x32xf32>
    %168 = arith.addf %141, %167 : vector<8x32xf32>
    %c0_51 = arith.constant 0 : index
    %c0_52 = arith.constant 0 : index
    %c0_53 = arith.constant 0 : index
    %169 = vector.load %arg11[%c0_51, %c0_52, %c0_53] : memref<1x8x32xf32, #tpu.memory_space<vmem>>, vector<1x8x32xf32>
    %170 = vector.shape_cast %169 : vector<1x8x32xf32> to vector<8x32xf32>
    %171 = vector.shape_cast %168 : vector<8x32xf32> to vector<1x8x32xf32>
    tpu.vector_store %arg11[%c0_51, %c0_52, %c0_53], %171 {strides = array<i32>} : memref<1x8x32xf32, #tpu.memory_space<vmem>>, vector<1x8x32xf32>,
    return
  }
  func.func @transform_0(%arg0: i32, %arg1: i32) -> (i32, i32, i32) {
    %c0_i32 = arith.constant 0 : i32
    %c0_i32_0 = arith.constant 0 : i32
    return %arg0, %arg1, %c0_i32 : i32, i32, i32
  }
  func.func @transform_1(%arg0: i32, %arg1: i32) -> (i32, i32) {
    %c0_i32 = arith.constant 0 : i32
    %c0_i32_0 = arith.constant 0 : i32
    return %arg1, %c0_i32 : i32, i32
  }
  func.func @transform_2(%arg0: i32, %arg1: i32) -> (i32, i32) {
    %c0_i32 = arith.constant 0 : i32
    %c0_i32_0 = arith.constant 0 : i32
    return %arg1, %c0_i32 : i32, i32
  }
  func.func @transform_3(%arg0: i32, %arg1: i32) -> (i32, i32) {
    %c0_i32 = arith.constant 0 : i32
    %c0_i32_0 = arith.constant 0 : i32
    %c0_i32_1 = arith.constant 0 : i32
    return %c0_i32, %c0_i32_0 : i32, i32
  }
  func.func @transform_4(%arg0: i32, %arg1: i32) -> (i32, i32) {
    %c0_i32 = arith.constant 0 : i32
    %c0_i32_0 = arith.constant 0 : i32
    %c0_i32_1 = arith.constant 0 : i32
    return %c0_i32, %c0_i32_0 : i32, i32
  }
  func.func @transform_5(%arg0: i32, %arg1: i32) -> (i32, i32) {
    %c0_i32 = arith.constant 0 : i32
    %c0_i32_0 = arith.constant 0 : i32
    %c0_i32_1 = arith.constant 0 : i32
    return %c0_i32, %c0_i32_0 : i32, i32
  }
  func.func @transform_6(%arg0: i32, %arg1: i32) -> (i32, i32) {
    %c0_i32 = arith.constant 0 : i32
    %c0_i32_0 = arith.constant 0 : i32
    %c0_i32_1 = arith.constant 0 : i32
    return %c0_i32, %c0_i32_0 : i32, i32
  }
  func.func @transform_7(%arg0: i32, %arg1: i32) -> (i32, i32) {
    %c0_i32 = arith.constant 0 : i32
    %c0_i32_0 = arith.constant 0 : i32
    %c0_i32_1 = arith.constant 0 : i32
    return %c0_i32, %c0_i32_0 : i32, i32
  }
  func.func @transform_8(%arg0: i32, %arg1: i32) -> (i32, i32) {
    %c0_i32 = arith.constant 0 : i32
    %c0_i32_0 = arith.constant 0 : i32
    %c0_i32_1 = arith.constant 0 : i32
    return %c0_i32, %c0_i32_0 : i32, i32
  }
  func.func @transform_9(%arg0: i32, %arg1: i32) -> (i32, i32, i32) {
    %c0_i32 = arith.constant 0 : i32
    %c0_i32_0 = arith.constant 0 : i32
    return %arg0, %arg1, %c0_i32 : i32, i32, i32
  }
}

</mosaic_0001>

<bundles_post_ra>
// kernel: tpu_custom_call.1
= control target key start
LH: loop header
LB: loop body
LE: loop exit
PB: predicated region body
PF: predicated region fallthrough
CT: control target
= control target key end

     0   :  { %s2681_s0 = inlined_call_operand.hbm [shape: f32[2,8,32], index: 0, kind: input, shape index: {}]   ;;  %s2682_s1 = inlined_call_operand.hbm [shape: f32[8,8], index: 1, kind: input, shape index: {}]   ;;  %s2683_s2 = inlined_call_operand.hbm [shape: f32[8,8], index: 2, kind: input, shape index: {}]   ;;  %s2684_s3 = inlined_call_operand.vmem [shape: f32[1,32], index: 3, kind: input, shape index: {}]   ;;  %s2685_s4 = inlined_call_operand.vmem [shape: f32[32,96], index: 4, kind: input, shape index: {}]   ;;  %s2686_s5 = inlined_call_operand.vmem [shape: f32[32,32], index: 5, kind: input, shape index: {}]   ;;  %s2687_s6 = inlined_call_operand.vmem [shape: f32[1,32], index: 6, kind: input, shape index: {}]   ;;  %s2688_s7 = inlined_call_operand.vmem [shape: f32[32,128], index: 7, kind: input, shape index: {}]   ;;  %s2689_s8 = inlined_call_operand.vmem [shape: f32[64,32], index: 8, kind: input, shape index: {}]   ;;  %s2690_s9 = inlined_call_operand.hbm [shape: f32[2,8,32], index: 9, kind: output, shape index: {}]  }
   0x1   :  { %2697 = sst [smem:[#allocation16_spill]] %s2682_s1 }
   0x2   :  { %14 = vsyncpa [#allocation5], 0 }
   0x3   :  { %16 = vsyncpa [#allocation5 + $0x1], 0 }
   0x4   :  { %17 = vsyncpa [#allocation8], 0 }
   0x5   :  { %18 = vsyncpa [#allocation6], 0 }
   0x6   :  { %20 = vsyncpa [#allocation6 + $0x1], 0  ;;  %s2274_s30 = smov 0   ;;  %s2276_s10 = smov 0  }
   0x7   :  { %s2278_s11 = smov 0   ;;  %s2280_s12 = smov 0  }
   0x8   :  { %s2282_s13 = smov 0   ;;  %s2284_s14 = smov 0  }
   0x9 LB: > { %2698 = sst [smem:[#allocation14_spill]] %s2180_s30  ;;  %s1736_s15 = sadd.s32 4294967295, %s2200_s14   ;;  %s2200_s14 = sphi %s2284_s14, %s26_s14   ;;  %s2196_s13 = sphi %s2282_s13, %s2721_s13   ;;  %s2192_s12 = sphi %s2280_s12, %s2720_s12   ;;  %s2188_s11 = sphi %s2278_s11, %s2719_s11   ;;  %s2184_s10 = sphi %s2276_s10, %s2718_s10   ;;  %s2180_s30 = sphi %s2274_s30, %s2717_s30  }
   0xa   : > { %s1737_s16 = sadd.s32 4294967294, %s2200_s14   ;;  %p60_p0 = scmp.ne.s32.totalorder %s2184_s10, %s2180_s30 }
   0xb   : > { %p2308_p1 = scmp.eq.s32.totalorder %s1736_s15, 0  ;;  %p2312_p2 = scmp.eq.s32.totalorder %s1736_s15, 1 }
   0xc   : > { %p270_p3 = scmp.eq.s32.totalorder %s1737_s16, 1  ;;  %p1738_p5 = scmp.ge.s32.totalorder %s2200_s14, 1 }
   0xd   : > { %s2699_s17 = scalar_select %p2308_p1, 1, 0 }
   0xe   : > { %s2700_s18 = scalar_select %p2312_p2, 1, 0 }
   0xf   : > { %p2318_p4 = por %p2308_p1, %p60_p0  ;;  %p2323_p6 = por %p270_p3, %p60_p0 }
  0x10   : > { %p277_p7 = scmp.lt.s32.totalorder %s2200_s14, 3  ;;  %s2202_s22 = smov [#allocation7]  }
  0x11   : > { %s2701_s19 = scalar_select %p2318_p4, 1, 0 }
  0x12   : > { %s2702_s20 = scalar_select %p2323_p6, 1, 0 }
  0x13   : > { %p2328_p8 = pnand %p1738_p5, %p277_p7  ;;  %s292_s23 = sshll.u32 %s2202_s22, 4  ;;  %s293_s23 = int_to_ptr.vmem [resolvable:$true] %s292_s23 }
  0x14   : > { %2703 = sst [smem:[#allocation15_spill]] %s2702_s20  ;;  %s2203_s24 = smov [#allocation9]  }
  0x15   : > { %s2704_s21 = scalar_select %p2328_p8, 1, 0 }
  0x16   : > { %p1919_p10 = pneg %p2328_p8  ;;  %s305_s25 = sshll.u32 %s2203_s24, 4  ;;  %s2341_s25 = int_to_ptr.vmem [resolvable:$true] %s305_s25 }
  0x17   : > { %s2706_s1 = sld [smem:[#allocation16_spill]] }
  0x18   : > { %p2337_p11 = pnand %p1919_p10, %p2308_p1 }
  0x1a   : > { %p2030_p13 = pneg %p2337_p11 }
  0x1d   : > { %s2028_s29 = scalar_lea.hbm %s2706_s1, 128 }
  0x1e   : > { %p2029_p12 = scmp.ne.s32.totalorder %s2706_s1, %s2028_s29  ;;  %p2035_p5 = scmp.lt.u32.totalorder %s2028_s29, %s2706_s1 }
  0x20   : > { %p2031_p0 = pnand %p2030_p13, %p2029_p12 }
  0x22   : > { %p2032_p3 = pneg %p2031_p0 }
  0x24   : > { %p2037_p7 = pnand %p2035_p5, %p2032_p3 }
  0x26   : > { %2040 = shalt.err (!%p2037_p7)
}
  0x27   : > { %s2041_s20 = scalar_lea.vmem %s293_s23, 128  ;;  %p2049_p1 = scmp.lt.s32.totalorder %s293_s23, %s293_s23 }
  0x28   : > { %p2042_p10 = scmp.ne.s32.totalorder %s293_s23, %s2041_s20  ;;  %p2050_p4 = scmp.lt.s32.totalorder %s2041_s20, %s2041_s20 }
  0x2a   : > { %p2044_p9 = pnand %p2042_p10, %p2030_p13  ;;  %p2051_p8 = por %p2050_p4, %p2049_p1 }
  0x2c   : > { %p2045_p6 = pneg %p2044_p9 }
  0x2e   : > { %p2052_p2 = pnand %p2051_p8, %p2045_p6 }
  0x30   : > { %2055 = shalt.err (!%p2052_p2)
}
  0x31   : > { %1922 = dma.hbm_to_vmem [thread:$0]  (!%p2337_p11), %s2706_s1, 128, %s293_s23, [#allocation8]  }
  0x32   : > { %s2056_s16 = scalar_lea.hbm %s2683_s2, 128 }
  0x33   : > { %p2057_p9 = scmp.ne.s32.totalorder %s2683_s2, %s2056_s16  ;;  %p2063_p2 = scmp.lt.u32.totalorder %s2056_s16, %s2683_s2 }
  0x35   : > { %p2059_p1 = pnand %p2057_p9, %p2030_p13 }
  0x37   : > { %p2060_p4 = pneg %p2059_p1 }
  0x39   : > { %p2065_p6 = pnand %p2063_p2, %p2060_p4 }
  0x3b   : > { %2068 = shalt.err (!%p2065_p6)
}
  0x3c   : > { %s2069_s23 = scalar_lea.vmem %s2341_s25, 128  ;;  %p2077_p3 = scmp.lt.s32.totalorder %s2341_s25, %s2341_s25 }
  0x3d   : > { %p2070_p8 = scmp.ne.s32.totalorder %s2341_s25, %s2069_s23  ;;  %p2078_p5 = scmp.lt.s32.totalorder %s2069_s23, %s2069_s23 }
  0x3f   : > { %p2072_p12 = pnand %p2070_p8, %p2030_p13  ;;  %p2079_p7 = por %p2078_p5, %p2077_p3 }
  0x41   : > { %p2073_p0 = pneg %p2072_p12 }
  0x43   : > { %p2080_p10 = pnand %p2079_p7, %p2073_p0 }
  0x45   : > { %2083 = shalt.err (!%p2080_p10)
}
  0x46   : > { %1925 = dma.hbm_to_vmem [thread:$0]  (!%p2337_p11), %s2683_s2, 128, %s2341_s25, [#allocation8]  }
  0x47   : > { %s38_s28 = sadd.s32 1, %s2196_s13  ;;  %s47_s29 = sadd.s32 1, %s2188_s11 }
  0x48   : > { %p40_p13 = scmp.ge.s32.totalorder %s38_s28, 2  ;;  %p54_p9 = scmp.ne.s32.totalorder %s2188_s11, %s2184_s10 }
  0x49   : > { %p55_p1 = scmp.eq.s32.totalorder %s2200_s14, 0  ;;  %p1936_p4 = scmp.lt.s32.totalorder %s2200_s14, 2 }
  0x4a   : > { %s2723_s28 = smov (%p40_p13, %s38_s28), 0  ;;  %p2707_p6 = scmp.ne.s32.totalorder %s2700_s18, 0 }
  0x4b   : > { %p56_p2 = por %p55_p1, %p54_p9  ;;  %s42_s15 = ssub.s32 %s2196_s13, %s2723_s28 }
  0x4c   : > { %p2400_p8 = por %p2707_p6, %p54_p9  ;;  %s334_s16 = sand.u32 1, %s2188_s11  }
  0x4d   : > { %p45_p12 = scmp.eq.s32.totalorder %s42_s15, 0  ;;  %s1742_s25 = sshll.u32 %s334_s16, 3 }
  0x4e   : > { %s1743_s22 = sshll.u32 %s2196_s13, 7  ;;  %s338_s18 = scalar_lea.vmem [#allocation4], %s1742_s25 }
  0x4f   : > { %s2409_s24 = scalar_select %p45_p12, %s2188_s11, %s47_s29  }
  0x50   : > { %s2414_s30 = scalar_lea.hbm %s2681_s0, %s1743_s22  ;;  %s346_s27 = sshll.u32 %s338_s18, 4  ;;  %s2422_s27 = int_to_ptr.vmem [resolvable:$true] %s346_s27 }
  0x51   : > { %p2418_p11 = pnand %p1936_p4, %p56_p2  ;;  %s335_s29 = scalar_lea.sflag [#allocation5], %s334_s16 }
  0x52   : > { %s2084_s15 = scalar_lea.hbm %s2414_s30, 128  ;;  %s2089_s20 = scalar_lea.hbm %s2681_s0, 256 }
  0x53   : > { %p2085_p0 = scmp.ne.s32.totalorder %s2414_s30, %s2084_s15  ;;  %p2086_p3 = pneg %p2418_p11 }
  0x54   : > { %p2090_p10 = scmp.lt.u32.totalorder %s2414_s30, %s2681_s0  ;;  %p2091_p13 = scmp.lt.u32.totalorder %s2089_s20, %s2084_s15 }
  0x55   : > { %p2087_p5 = pnand %p2086_p3, %p2085_p0  ;;  %p2093_p1 = scmp.lt.u32.totalorder %s2084_s15, %s2414_s30 }
  0x56   : > { %p2092_p9 = por %p2091_p13, %p2090_p10 }
  0x57   : > { %p2088_p7 = pneg %p2087_p5 }
  0x58   : > { %p2094_p4 = por %p2093_p1, %p2092_p9 }
  0x5a   : > { %p2095_p2 = pnand %p2094_p4, %p2088_p7 }
  0x5c   : > { %2098 = shalt.err (!%p2095_p2)
}
  0x5d   : > { %s2099_s16 = scalar_lea.vmem %s2422_s27, 128  ;;  %s2204_s25 = smov [#allocation4]  }
  0x5e   : > { %p2100_p6 = scmp.ne.s32.totalorder %s2422_s27, %s2099_s16  ;;  %s2104_s22 = sshll.u32 %s2204_s25, 4  ;;  %s2105_s22 = int_to_ptr.vmem [resolvable:$false] %s2104_s22 }
  0x5f   : > { %s2106_s23 = scalar_lea.vmem %s2105_s22, 256  ;;  %p2107_p5 = scmp.lt.s32.totalorder %s2422_s27, %s2105_s22 }
  0x60   : > { %p2102_p12 = pnand %p2100_p6, %p2086_p3  ;;  %p2108_p10 = scmp.lt.s32.totalorder %s2106_s23, %s2099_s16 }
  0x62   : > { %p2103_p0 = pneg %p2102_p12  ;;  %p2109_p13 = por %p2108_p10, %p2107_p5 }
  0x64   : > { %p2110_p9 = pnand %p2109_p13, %p2103_p0 }
  0x66   : > { %2113 = shalt.err (!%p2110_p9)
}
  0x67   : > { %1929 = dma.hbm_to_vmem [thread:$0]  (!%p2418_p11), %s2414_s30, 128, %s2422_s27, %s335_s29  }
  0x68   : > { %p2710_p7 = scmp.ne.s32.totalorder %s2704_s21, 0 }
  0x69   : > { %s2452_s15 = sand.u32 (!%p2710_p7), 1, %s2184_s10   ;;  %p2711_p3 = scmp.ne.s32.totalorder (!%p2710_p7), %s2701_s19, 0 }
  0x6a   : > { %355 = sbr.rel (%p2710_p7) target bundleno = 2509 (0x9cd), region = 56  ;;  %s1745_s20 = sshll.u32 (!%p2710_p7), %s2452_s15, 3 }
  0x6b   : > { %s358_s18 = scalar_lea.sflag (!%p2710_p7), [#allocation5], %s2452_s15  ;;  %s361_s16 = scalar_lea.vmem (!%p2710_p7), [#allocation4], %s1745_s20 }
  0x71   : > { %2167 = dma.done.wait (%p2711_p3), %s358_s18, 128  }
  0x72   : > { %2169 = vsyncadd (%p2711_p3), %s358_s18, 4294967168  ;;  %p2712_p11 = scmp.ne.s32.totalorder %s2699_s17, 0 }
  0x74   : > { %2171 = dma.done.wait (%p2712_p11), [#allocation8], 256  }
  0x75   : > { %2173 = vsyncadd (%p2712_p11), [#allocation8], 4294967040  ;;  %v2466_v0 = vld [vmem:[%s361_s16] sm:$0xff]  ;;  %vm408_vm0 = vcmask 261120   ;;  %v426_v5 = vld [vmem:[%s2685_s4 + $0x10] sm:$0xff]  ;;  %v2205_v6 = vmov 0.0|0.0  }
  0x76   : > { %v407_v1 = vmul.f32 %v2466_v0, %v2466_v0  ;;  %v424_v3 = vld [vmem:[%s2685_s4] sm:$0xff]  ;;  %v425_v4 = vld [vmem:[%s2685_s4 + $0x8] sm:$0xff]  ;;  %1877 = vmatprep.subr.bf16.mxu1 %v2205_v6  ;;  %v427_v8 = vld [vmem:[%s2685_s4 + $0x18] sm:$0xff]  ;;  %vm2206_vm1 = vmmov 0   ;;  %v2207_v9 = vmov 0.0   ;;  %s2208_s18 = smov 100  }
  0x77   : > { %v1878_v7 = vpack.c.bf16 %v425_v4, %v424_v3  ;;  %1813 = vmatprep.mubr.msk.f32.mxu1 %vm2206_vm1, %v2207_v9  ;;  %1826 = vmatprep.subr.mxu0 %v2207_v9  ;;  %v1881_v10 = vpack.c.bf16 %v427_v8, %v426_v5  ;;  %v1749_v15 = vld [vmem:[%s2684_s3] ss:$0 sm:$0xff]  ;;  %v501_v18 = vld [vmem:[#allocation7] sm:$0xff]  ;;  %s2209_s16 = smov 92   ;;  %s2210_s1 = smov 76   ;;  %vm517_vm2 = vcmask 31744  }
  0x78   : > { %v409_v2 = vsel %vm408_vm0, %v407_v1, 0.0  ;;  %1828 = vmatprep.mubr.msk.f32.mxu0 %vm2206_vm1, %v2207_v9  ;;  %s2211_s21 = smov 48   ;;  %s2212_s19 = smov 84   ;;  %v502_v24 = vld [vmem:[#allocation9] sm:$0xff]  ;;  %vm532_vm3 = vcmask 64512   ;;  %vm562_vm4 = vcmask 130048  }
  0x79   : > { %410 = vadd.xlane.f32.xlu0 %v409_v2  ;;  %1879 = vmatpush3.bf16.msra.mxu1 %v1878_v7  ;;  %s2213_s30 = smov 16   ;;  %s2214_s27 = smov 108   ;;  %v610_v7 = vlaneseq  ;;  %vm1511_vm6 = vcmask 523264  }
  0x7a   : > { %1880 = vmatprep.subr.bf16.mxu1 %v2205_v6  ;;  %s2215_s17 = smov 116   ;;  %s2216_s29 = smov 32  }
  0x7b   : > { %s2217_s25 = smov 96   ;;  %s2218_s22 = smov 80   ;;  %v611_v8 = vshrl.u32 %v610_v7, 7 }
  0x7c   : > { %s2219_s23 = smov 4  }
  0x7d   : > { %1882 = vmatpush3.bf16.msra.mxu1 %v1881_v10  ;;  %v615_v10 = vand.u32 127, %v610_v7 }
  0x7e   : > { %1816 = vmatprep.subr.mxu1 %v2207_v9 }
  0x7f   : > { %vm968_vm5 = vcmp.le.s32.totalorder %v615_v10, %v611_v8  ;;  %v1414_v8 = vld [vmem:[%s2688_s7] sm:$0xff]  ;;  %v1415_v10 = vld [vmem:[%s2688_s7 + $0x8] sm:$0xff] }
 0x106   : > { %v411_v11 = vpop.xlane.xlu0 %410 }
 0x107   : > { %v413_v12 = vmul.f32 0.03125, %v411_v11 }
 0x109   : > { %v414_v13 = vadd.f32 1e-05, %v413_v12 }
 0x10b   : > { %2008 = vrsqrt.f32 %v414_v13 }
 0x115   : > { %v2009_v14 = vpop.eup %2008 }
 0x116   : > { %v416_v16 = vmul.f32 %v2009_v14, %v2466_v0 }
 0x118   : > { %v423_v17 = vmul.f32 %v1749_v15, %v416_v16 }
 0x11a   : > { %1814 = vmatmul.mubr.msk.f32.vlgmr.msra.gmra.mrb[0].mxu1 %vm408_vm0, %v423_v17 }
 0x11b   : > { %1818 = vmatprep.mubr.msk.f32.mxu1 %vm2206_vm1, %v2207_v9 }
 0x1ed   : > { %v2498_v19 = vpop.f32.mrb[0].mxu1 }
 0x1ee   : > { %514 = vrot.lane.b32.xlu1 %v2498_v19, %s2208_s18  ;;  %v1815_v20 = vpop.f32.mrb[1].mxu1  ;;  %v508_v21 = vsub.f32 0.0, %v2498_v19  ;;  %v2503_v22 = vmul.f32 %v501_v18, %v2498_v19  ;;  %s2220_s18 = smov 124  }
 0x1f0   : > { %510 = vrot.lane.b32.xlu0 %v508_v21, %s2209_s16  ;;  %s2221_s16 = smov 112  }
 0x1f2   : > { %538 = vrot.lane.b32.xlu1 %v508_v21, %s2210_s1  ;;  %s2222_s1 = smov 64  }
 0x1f4   : > { %534 = vrot.lane.b32.xlu0 %v501_v18, %s2211_s21 }
 0x1f6   : > { %541 = vrot.lane.b32.xlu1 %v2498_v19, %s2212_s19  ;;  %s1770_s19 = sshll.u32 %s2192_s12, 7 }
 0x1f8   : > { %586 = vrot.lane.b32.xlu0 %v501_v18, %s2213_s30 }
 0x1fa   : > { %590 = vrot.lane.b32.xlu1 %v508_v21, %s2214_s27  ;;  %s403_s27 = scalar_lea.vmem [#allocation10], %s1745_s20  ;;  %s2223_s20 = smov [#allocation10]  }
 0x1fe   : > { %593 = vrot.lane.b32.xlu1 %v2498_v19, %s2215_s17  ;;  %s1602_s17 = sshll.u32 %s403_s27, 4  ;;  %s2633_s17 = int_to_ptr.vmem [resolvable:$true] %s1602_s17 }
 0x1ff   : > { %s2114_s12 = scalar_lea.vmem %s2633_s17, 128 }
 0x200   : > { %p2115_p1 = scmp.ne.s32.totalorder %s2633_s17, %s2114_s12 }
 0x202   : > { %504 = vrot.lane.b32.xlu1 %v501_v18, %s2216_s29  ;;  %p2116_p4 = pnand %p2115_p1, %p2400_p8 }
 0x204   : > { %p2117_p2 = pneg %p2116_p4 }
 0x260   : > { %v515_v23 = vpop.permute.xlu1 %514 }
 0x262   : > { %v511_v25 = vpop.permute.xlu0 %510 }
 0x263   : > { %v518_v26 = vsel %vm517_vm2, %v511_v25, %v515_v23 }
 0x264   : > { %v519_v27 = vmul.f32 %v518_v26, %v502_v24  ;;  %v539_v28 = vpop.permute.xlu1 %538 }
 0x266   : > { %521 = vrot.lane.b32.xlu1 %v519_v27, %s2216_s29  ;;  %v535_v40 = vpop.permute.xlu0 %534 }
 0x267   : > { %v537_v41 = vmul.f32 %v535_v40, %v2498_v19 }
 0x268   : > { %v542_v29 = vpop.permute.xlu1 %541 }
 0x269   : > { %v544_v30 = vsel %vm517_vm2, %v539_v28, %v542_v29 }
 0x26a   : > { %v545_v31 = vmul.f32 %v544_v30, %v502_v24  ;;  %v587_v44 = vpop.permute.xlu0 %586 }
 0x26b   : > { %v589_v45 = vmul.f32 %v587_v44, %v2498_v19 }
 0x26c   : > { %v591_v32 = vpop.permute.xlu1 %590  ;;  %547 = vrot.lane.b32.xlu1 %v545_v31, %s2211_s21 }
 0x270   : > { %v594_v33 = vpop.permute.xlu1 %593 }
 0x271   : > { %v596_v34 = vsel %vm517_vm2, %v591_v32, %v594_v33 }
 0x272   : > { %v597_v35 = vmul.f32 %v596_v34, %v502_v24 }
 0x274   : > { %599 = vrot.lane.b32.xlu1 %v597_v35, %s2213_s30  ;;  %v505_v36 = vpop.permute.xlu1 %504  ;;  %v1320_v35 = vld [vmem:[%s2686_s5] sm:$0xff] }
 0x275   : > { %v507_v37 = vmul.f32 %v505_v36, %v2498_v19  ;;  %v1321_v36 = vld [vmem:[%s2686_s5 + $0x8] sm:$0xff] }
 0x278   : > { %529 = vrot.lane.b32.xlu1 %v2498_v19, %s2217_s25 }
 0x27c   : > { %555 = vrot.lane.b32.xlu1 %v2498_v19, %s2218_s22 }
 0x280   : > { %578 = vrot.lane.b32.xlu1 %v2498_v19, %s2219_s23  ;;  %s2118_s23 = sshll.u32 %s2223_s20, 4  ;;  %s2119_s23 = int_to_ptr.vmem [resolvable:$false] %s2118_s23 }
 0x281   : > { %p2121_p6 = scmp.lt.s32.totalorder %s2633_s17, %s2119_s23 }
 0x2d8   : > { %v522_v38 = vpop.permute.xlu1 %521 }
 0x2d9   : > { %v524_v39 = vadd.f32 %v522_v38, %v507_v37  ;;  %v1322_v37 = vld [vmem:[%s2686_s5 + $0x10] sm:$0xff]  ;;  %v1884_v38 = vpack.c.bf16 %v1321_v36, %v1320_v35 }
 0x2db   : > { %526 = vrot.lane.b32.xlu0 %v524_v39, %s2217_s25  ;;  %v1323_v39 = vld [vmem:[%s2686_s5 + $0x18] sm:$0xff]  ;;  %s2631_s25 = scalar_lea.hbm %s2690_s9, %s1770_s19 }
 0x2dc   : > { %v1887_v40 = vpack.c.bf16 %v1323_v39, %v1322_v37 }
 0x2de   : > { %v548_v42 = vpop.permute.xlu1 %547 }
 0x2df   : > { %v550_v43 = vadd.f32 %v548_v42, %v537_v41 }
 0x2e1   : > { %552 = vrot.lane.b32.xlu0 %v550_v43, %s2218_s22  ;;  %s1588_s22 = scalar_lea.sflag [#allocation6], %s2452_s15 }
 0x2e5   : > { %575 = vrot.lane.b32.xlu0 %v508_v21, %s2220_s18  ;;  %s2120_s18 = scalar_lea.vmem %s2119_s23, 256 }
 0x2e6   : > { %v600_v46 = vpop.permute.xlu1 %599  ;;  %p2122_p12 = scmp.lt.s32.totalorder %s2120_s18, %s2114_s12 }
 0x2e7   : > { %v602_v47 = vadd.f32 %v600_v46, %v589_v45 }
 0x2e8   : > { %p2123_p0 = por %p2122_p12, %p2121_p6 }
 0x2e9   : > { %559 = vrot.lane.b32.xlu0 %v2498_v19, %s2221_s16  ;;  %604 = vrot.lane.b32.xlu1 %v602_v47, %s2221_s16 }
 0x2ea   : > { %v530_v48 = vpop.permute.xlu1 %529  ;;  %p2124_p5 = pnand %p2123_p0, %p2117_p2 }
 0x2ee   : > { %v556_v51 = vpop.permute.xlu1 %555 }
 0x2f2   : > { %v579_v55 = vpop.permute.xlu1 %578 }
 0x34d   : > { %v527_v49 = vpop.permute.xlu0 %526 }
 0x34e   : > { %v533_v50 = vsel %vm532_vm3, %v527_v49, %v530_v48 }
 0x34f   : > { %563 = vst.msk [vmem:[#allocation2] sm:$0xff] %vm562_vm4, %v533_v50 }
 0x353   : > { %v553_v52 = vpop.permute.xlu0 %552 }
 0x354   : > { %v558_v53 = vsel %vm532_vm3, %v553_v52, %v556_v51 }
 0x355   : > { %564 = vst.msk [vmem:[#allocation2 + $0x8] sm:$0xff] %vm562_vm4, %v558_v53 }
 0x356   : > { %v969_v54 = vld [vmem:[#allocation2] sm:$0xff] }
 0x357   : > { %1817 = vmatpush3.xpose.msk.msra.mxu1 %vm562_vm4, %v969_v54  ;;  %v576_v56 = vpop.permute.xlu0 %575 }
 0x358   : > { %v581_v57 = vsel %vm517_vm2, %v576_v56, %v579_v55  ;;  %1821 = vmatprep.subr.mxu1 %v2207_v9 }
 0x359   : > { %v582_v58 = vmul.f32 %v581_v57, %v502_v24 }
 0x35b   : > { %v583_v59 = vadd.f32 %v582_v58, %v2503_v22  ;;  %v560_v60 = vpop.permute.xlu0 %559  ;;  %v605_v61 = vpop.permute.xlu1 %604 }
 0x35c   : > { %567 = vrot.lane.b32.xlu1 %v560_v60, %s2222_s1  ;;  %v608_v1 = vsel %vm532_vm3, %v605_v61, %v560_v60  ;;  %v970_v2 = vld [vmem:[#allocation2 + $0x8] sm:$0xff] }
 0x35d   : > { %v584_v62 = vsel %vm532_vm3, %v583_v59, %v2498_v19  ;;  %v609_v3 = vmul.f32 0.25, %v608_v1 }
 0x35e   : > { %v585_v63 = vmul.f32 0.25, %v584_v62 }
 0x360   : > { %1819 = vmatmul.mubr.msk.f32.vlgmr.msra.gmra.mrb[2].mxu1 %vm562_vm4, %v585_v63 }
 0x361   : > { %1822 = vmatpush3.xpose.msk.msra.mxu1 %vm562_vm4, %v970_v2  ;;  %1823 = vmatprep.mubr.msk.f32.mxu1 %vm2206_vm1, %v2207_v9 }
 0x362   : > { %1831 = vmatprep.subr.mxu1 %v2207_v9 }
 0x364   : > { %1824 = vmatmul.mubr.msk.f32.vlgmr.msra.gmra.mrb[4].mxu1 %vm562_vm4, %v609_v3 }
 0x365   : > { %1833 = vmatprep.mubr.msk.f32.mxu1 %vm2206_vm1, %v2207_v9 }
 0x3ce   : > { %v568_v4 = vpop.permute.xlu1 %567 }
 0x3cf   : > { %573 = vst.msk [vmem:[#allocation3 + $0x8] sm:$0xff] %vm562_vm4, %v568_v4 }
 0x3d6   : > { %v972_v5 = vld [vmem:[#allocation3 + $0x8] sm:$0xff] }
 0x3d7   : > { %1832 = vmatpush3.msra.mxu1 %v972_v5 }
 0x3d8   : > { %1889 = vmatprep.subr.bf16.mxu1 %v2205_v6 }
 0x433   : > { %v1045_v11 = vpop.f32.mrb[2].mxu1 }
 0x434   : > { %v1127_v12 = vsel %vm968_vm5, %v1045_v11, -1e+30  ;;  %v1820_v13 = vpop.f32.mrb[3].mxu1  ;;  %v1890_v11 = vpack.c.bf16 %v1415_v10, %v1414_v8 }
 0x435   : > { %v1129_v14 = vsel %vm532_vm3, %v1127_v12, -inf }
 0x436   : > { %1130 = vmax.xlane.f32.xlu1 %v1129_v14 }
 0x437   : > { %v1121_v15 = vpop.f32.mrb[4].mxu1 }
 0x438   : > { %v1128_v16 = vsel %vm968_vm5, %v1121_v15, -1e+30  ;;  %v1825_v17 = vpop.f32.mrb[5].mxu1 }
 0x439   : > { %v1132_v18 = vsel %vm532_vm3, %v1128_v16, -inf  ;;  %v1765_v17 = vld [vmem:[%s2687_s6] ss:$0 sm:$0xff] }
 0x43a   : > { %1133 = vmax.xlane.f32.xlu0 %v1132_v18 }
 0x450   : > { %565 = vrot.lane.b32.xlu0 %v2498_v19, %s2222_s1 }
 0x4c3   : > { %v1131_v20 = vpop.xlane.xlu1 %1130 }
 0x4c4   : > { %v1135_v21 = vmax.f32 %v1131_v20, -1e+30 }
 0x4c6   : > { %v1137_v22 = vsub.f32 %v1127_v12, %v1135_v21  ;;  %v1145_v41 = vsub.f32 -1e+30, %v1135_v21  ;;  %v1503_v21 = vld [vmem:[%s2689_s8] sm:$0xff] }
 0x4c7   : > { %v1134_v23 = vpop.xlane.xlu0 %1133 }
 0x4c8   : > { %v1139_v24 = vmul.f32 1.442695, %v1137_v22  ;;  %v1136_v25 = vmax.f32 %v1134_v23, -1e+30  ;;  %v1147_v42 = vmul.f32 1.442695, %v1145_v41 }
 0x4c9   : > { %v1504_v22 = vld [vmem:[%s2689_s8 + $0x8] sm:$0xff]  ;;  %v1505_v23 = vld [vmem:[%s2689_s8 + $0x10] sm:$0xff] }
 0x4ca   : > { %2010 = vpow2.f32 %v1139_v24  ;;  %v1138_v26 = vsub.f32 %v1128_v16, %v1136_v25  ;;  %v1146_v43 = vsub.f32 -1e+30, %v1136_v25  ;;  %v1896_v24 = vpack.c.bf16 %v1504_v22, %v1503_v21  ;;  %v1506_v25 = vld [vmem:[%s2689_s8 + $0x18] sm:$0xff] }
 0x4cb   : > { %v566_v27 = vpop.permute.xlu0 %565 }
 0x4cc   : > { %v1141_v28 = vmul.f32 1.442695, %v1138_v26  ;;  %572 = vst.msk [vmem:[#allocation3] sm:$0xff] %vm562_vm4, %v566_v27  ;;  %v1149_v44 = vmul.f32 1.442695, %v1146_v43  ;;  %v1899_v26 = vpack.c.bf16 %v1506_v25, %v1505_v23  ;;  %v1507_v27 = vld [vmem:[%s2689_s8 + $0x20] sm:$0xff] }
 0x4ce   : > { %2012 = vpow2.f32 %v1141_v28  ;;  %v1508_v28 = vld [vmem:[%s2689_s8 + $0x28] sm:$0xff] }
 0x4cf   : > { %2014 = vpow2.f32 %v1147_v42 }
 0x4d0   : > { %2016 = vpow2.f32 %v1149_v44 }
 0x4d3   : > { %v971_v29 = vld [vmem:[#allocation3] sm:$0xff] }
 0x4d4   : > { %v2011_v30 = vpop.eup %2010  ;;  %1827 = vmatpush3.msra.mxu0 %v971_v29  ;;  %v1902_v29 = vpack.c.bf16 %v1508_v28, %v1507_v27 }
 0x4d5   : > { %v1143_v31 = vsel %vm968_vm5, %v2011_v30, 0.0  ;;  %1883 = vmatprep.subr.bf16.mxu0 %v2205_v6  ;;  %v1509_v30 = vld [vmem:[%s2689_s8 + $0x30] sm:$0xff] }
 0x4d6   : > { %1829 = vmatmul.mubr.msk.f32.vlgmr.msra.gmra.mrb[0].mxu0 %vm532_vm3, %v1143_v31  ;;  %v1153_v34 = vsel %vm532_vm3, %v1143_v31, 0.0  ;;  %v1510_v31 = vld [vmem:[%s2689_s8 + $0x38] sm:$0xff] }
 0x4d7   : > { %1844 = vmatprep.mubr.msk.f32.mxu0 %vm2206_vm1, %v2207_v9  ;;  %1885 = vmatpush3.bf16.msra.mxu0 %v1884_v38 }
 0x4d8   : > { %v2013_v19 = vpop.eup %2012  ;;  %1886 = vmatprep.subr.bf16.mxu0 %v2205_v6 }
 0x4d9   : > { %v1144_v32 = vsel %vm968_vm5, %v2013_v19, 0.0  ;;  %v2015_v46 = vpop.eup %2014  ;;  %v1905_v19 = vpack.c.bf16 %v1510_v31, %v1509_v30 }
 0x4da   : > { %1834 = vmatmul.mubr.msk.f32.vlgmr.msra.gmra.mrb[6].mxu1 %vm532_vm3, %v1144_v32  ;;  %v1156_v33 = vsel %vm532_vm3, %v1144_v32, 0.0  ;;  %v1151_v48 = vmul.f32 0.0, %v2015_v46  ;;  %v2017_v49 = vpop.eup %2016 }
 0x4db   : > { %1157 = vadd.xlane.f32.xlu1 %v1156_v33  ;;  %1855 = vmatprep.mubr.msk.f32.mxu1 %vm2206_vm1, %v2207_v9  ;;  %v1152_v51 = vmul.f32 0.0, %v2017_v49 }
 0x4dc   : > { %1888 = vmatpush3.bf16.msra.mxu0 %v1887_v40  ;;  %1891 = vmatpush3.bf16.msra.mxu1 %v1890_v11 }
 0x4dd   : > { %1895 = vmatprep.subr.bf16.mxu0 %v2205_v6  ;;  %1892 = vmatprep.subr.bf16.mxu1 %v2205_v6 }
 0x4df   : > { %1154 = vadd.xlane.f32.xlu1 %v1153_v34 }
 0x568   : > { %v1158_v45 = vpop.xlane.xlu1 %1157 }
 0x569   : > { %v1160_v52 = vadd.f32 %v1158_v45, %v1152_v51 }
 0x56c   : > { %v1155_v47 = vpop.xlane.xlu1 %1154 }
 0x56d   : > { %v1159_v50 = vadd.f32 %v1155_v47, %v1151_v48 }
 0x56f   : > { %2018 = vrcp.f32 %v1159_v50 }
 0x570   : > { %2020 = vrcp.f32 %v1160_v52 }
 0x579   : > { %v2019_v56 = vpop.eup %2018 }
 0x57a   : > { %v2021_v61 = vpop.eup %2020 }
 0x5a9   : > { %v1232_v53 = vpop.f32.mrb[0].mxu0 }
 0x5aa   : > { %v1309_v54 = vadd.f32 %v1232_v53, %v1151_v48  ;;  %v1830_v55 = vpop.f32.mrb[1].mxu0 }
 0x5ac   : > { %v1313_v57 = vmul.f32 %v2019_v56, %v1309_v54 }
 0x5ad   : > { %v1305_v58 = vpop.f32.mrb[6].mxu1 }
 0x5ae   : > { %v1310_v59 = vadd.f32 %v1305_v58, %v1152_v51  ;;  %v1835_v60 = vpop.f32.mrb[7].mxu1 }
 0x5b0   : > { %v1314_v62 = vmul.f32 %v2021_v61, %v1310_v59 }
 0x5b2   : > { %1316 = vrot.lane.b32.xlu1 %v1314_v62, %s2213_s30 }
 0x624   : > { %v1317_v63 = vpop.permute.xlu1 %1316 }
 0x625   : > { %v1319_v1 = vsel %vm562_vm4, %v1313_v57, %v1317_v63 }
 0x626   : > { %1845 = vmatmul.mubr.msk.f32.vlgmr.msra.gmra.mrb[2].mxu0 %vm408_vm0, %v1319_v1 }
 0x627   : > { %1874 = vmatprep.mubr.msk.f32.mxu0 %vm2206_vm1, %v2207_v9  ;;  %v1417_v9 = vld [vmem:[%s2688_s7 + $0x18] sm:$0xff]  ;;  %1897 = vmatpush3.bf16.msra.mxu0 %v1896_v24 }
 0x628   : > { %1898 = vmatprep.subr.bf16.mxu0 %v2205_v6 }
 0x62b   : > { %1900 = vmatpush3.bf16.msra.mxu0 %v1899_v26 }
 0x62c   : > { %1901 = vmatprep.subr.bf16.mxu0 %v2205_v6 }
 0x62f   : > { %1903 = vmatpush3.bf16.msra.mxu0 %v1902_v29 }
 0x630   : > { %1904 = vmatprep.subr.bf16.mxu0 %v2205_v6 }
 0x633   : > { %1906 = vmatpush3.bf16.msra.mxu0 %v1905_v19 }
 0x6f9   : > { %v1393_v2 = vpop.f32.mrb[2].mxu0 }
 0x6fa   : > { %v1397_v3 = vadd.f32 %v1393_v2, %v2466_v0  ;;  %v1846_v4 = vpop.f32.mrb[3].mxu0  ;;  %v1416_v0 = vld [vmem:[%s2688_s7 + $0x10] sm:$0xff] }
 0x6fb   : > { %v1893_v12 = vpack.c.bf16 %v1417_v9, %v1416_v0 }
 0x6fc   : > { %v1399_v5 = vmul.f32 %v1397_v3, %v1397_v3 }
 0x6fd   : > { %1894 = vmatpush3.bf16.msra.mxu1 %v1893_v12 }
 0x6fe   : > { %v1400_v7 = vsel %vm408_vm0, %v1399_v5, 0.0 }
 0x6ff   : > { %1401 = vadd.xlane.f32.xlu0 %v1400_v7 }
 0x78c   : > { %v1402_v13 = vpop.xlane.xlu0 %1401 }
 0x78d   : > { %v1403_v14 = vmul.f32 0.03125, %v1402_v13 }
 0x78f   : > { %v1404_v15 = vadd.f32 1e-05, %v1403_v14 }
 0x791   : > { %2022 = vrsqrt.f32 %v1404_v15 }
 0x79b   : > { %v2023_v16 = vpop.eup %2022 }
 0x79c   : > { %v1406_v18 = vmul.f32 %v2023_v16, %v1397_v3 }
 0x79e   : > { %v1413_v20 = vmul.f32 %v1765_v17, %v1406_v18 }
 0x7a0   : > { %1856 = vmatmul.mubr.msk.f32.vlgmr.msra.gmra.mrb[8].mxu1 %vm408_vm0, %v1413_v20 }
 0x873   : > { %v1487_v32 = vpop.f32.mrb[8].mxu1 }
 0x874   : > { %1499 = vrot.lane.b32.xlu1 %v1487_v32, %s2222_s1  ;;  %v1857_v33 = vpop.f32.mrb[9].mxu1  ;;  %v1767_v34 = vmul.f32 -1.442695, %v1487_v32 }
 0x876   : > { %2024 = vpow2.f32 %v1767_v34 }
 0x880   : > { %v2025_v35 = vpop.eup %2024 }
 0x881   : > { %v1494_v36 = vadd.f32 1.0, %v2025_v35 }
 0x883   : > { %2026 = vrcp.f32 %v1494_v36 }
 0x88d   : > { %v2027_v37 = vpop.eup %2026 }
 0x88e   : > { %v1497_v38 = vmul.f32 %v2027_v37, %v1487_v32 }
 0x8e6   : > { %v1500_v39 = vpop.permute.xlu1 %1499 }
 0x8e7   : > { %v1502_v40 = vmul.f32 %v1500_v39, %v1497_v38 }
 0x8e9   : > { %1875 = vmatmul.mubr.msk.f32.vlgmr.msra.gmra.mrb[4].mxu0 %vm1511_vm6, %v1502_v40 }
 0x9bc   : > { %v1581_v6 = vpop.f32.mrb[4].mxu0 }
 0x9bd   : > { %v1585_v41 = vadd.f32 %v1581_v6, %v1397_v3  ;;  %v1876_v42 = vpop.f32.mrb[5].mxu0 }
 0x9bf   : > { %1586 = vst.msk [vmem:[%s403_s27] sm:$0xff] %vm408_vm0, %v1585_v41 }
 0x9c0   : > { %2127 = shalt.err (!%p2124_p5)
}
 0x9c1   : > { %s2128_s15 = scalar_lea.hbm %s2631_s25, 128  ;;  %s2132_s21 = scalar_lea.hbm %s2690_s9, 256 }
 0x9c2   : > { %p2129_p10 = scmp.ne.s32.totalorder %s2631_s25, %s2128_s15  ;;  %p2133_p7 = scmp.lt.u32.totalorder %s2631_s25, %s2690_s9 }
 0x9c3   : > { %p2134_p3 = scmp.lt.u32.totalorder %s2132_s21, %s2128_s15  ;;  %p2136_p1 = scmp.lt.u32.totalorder %s2128_s15, %s2631_s25 }
 0x9c4   : > { %p2130_p13 = pnand %p2129_p10, %p2400_p8 }
 0x9c5   : > { %p2135_p11 = por %p2134_p3, %p2133_p7 }
 0x9c6   : > { %p2131_p9 = pneg %p2130_p13 }
 0x9c7   : > { %p2137_p4 = por %p2136_p1, %p2135_p11 }
 0x9c9   : > { %p2138_p2 = pnand %p2137_p4, %p2131_p9 }
 0x9cb   : > { %2141 = shalt.err (!%p2138_p2)
}
 0x9cc   : > { %1917 = dma.vmem_to_hbm [thread:$0]  (%p2400_p8), %s2633_s17, 128, %s2631_s25, %s1588_s22  }
 0x9cd PF: > { %s2713_s1 = sld [smem:[#allocation14_spill]]  ;;  %s2714_s29 = sld [smem:[#allocation15_spill]] }
 0x9ce   : > { %p2716_p12 = scmp.ge.s32.totalorder %s2200_s14, 2 }
 0x9d3   : > { %s1614_s12 = sand.u32 1, %s2713_s1   ;;  %p2715_p6 = scmp.ne.s32.totalorder %s2714_s29, 0 }
 0x9d4   : > { %s1615_s20 = scalar_lea.sflag [#allocation6], %s1614_s12 }
 0x9d5   : > { %p1931_p0 = pnand %p2716_p12, %p2715_p6 }
 0x9d7   : > { %2175 = dma.done.wait (!%p1931_p0), %s1615_s20, 128  }
 0x9d8   : > { %2177 = vsyncadd (!%p1931_p0), %s1615_s20, 4294967168  ;;  %s26_s14 = sadd.s32 1, %s2200_s14   ;;  %s2717_s30 = smov %s2184_s10 }
 0x9d9   : > { %p23_p5 = scmp.ge.s32.totalorder %s26_s14, 4   ;;  %s2718_s10 = smov %s2188_s11 }
 0x9da   : > { %s2719_s11 = smov %s2409_s24  ;;  %s2720_s12 = smov %s2196_s13 }
 0x9db   : > { %s2721_s13 = smov %s2723_s28  ;;  %25 = sbr.rel (!%p23_p5) target bundleno = 9 (0x9), region = 133 }
 0x9e2   :  { %1620 = vsyncpa [#allocation5], 1 }
 0x9e3   :  { %1622 = vsyncpa [#allocation5 + $0x1], 1 }
 0x9e4   :  { %1623 = vsyncpa [#allocation8], 1 }
 0x9e5   :  { %1624 = vsyncpa [#allocation6], 1 }
 0x9e6   :  { %1626 = vsyncpa [#allocation6 + $0x1], 1 }

</bundles_post_ra>
